<compile_context>
chip_gen: v6e
topology: v6e:2x2x1
jax: 0.10.0
libtpu: 0.0.40
codegen_flags: <defaults>
</compile_context>

<pallas_src>
import functools

import numpy as np

import jax
import jax.numpy as jnp
from jax.experimental import pallas as pl
from jax.experimental.pallas import tpu as pltpu

NEG_SLOPE = 0.01   # torch.nn.LeakyReLU default
BN_EPS = 1e-5      # torch.nn.BatchNorm1d default


def _round_up(x, n):
    return ((x + n - 1) // n) * n


def _leaky(x):
    return jnp.where(x >= 0.0, x, NEG_SLOPE * x)


# --------------------------------------------------------------------------
# The single fused Pallas kernel
# --------------------------------------------------------------------------
def cnn_fused_kernel(*refs, n, c1, p1, m1_3, dense_meta, n_hid):
    """Fused forward pass.

    refs = (patch1t, w1t, b1,
            [dense_w_i, dense_b_i] * len(dense_meta),
            [fc_w_i, fc_b_i, bn_g_i, bn_b_i] * n_hid,
            fc_out_w, fc_out_b,
            out_ref, f1_scratch)

    patch1t : (K1p, m1^3 * n * p1)  im2col slab of the raw input, columns
              ordered (pz, py, px, n, zp, yp, xp)  -> pool windows are
              contiguous lane blocks.
    w1t     : (c1, K1p)   conv-1 weights, rows = out channel.
    dense_w : (F_in, m^3 * group)  densified deeper conv layer; columns
              ordered (pz, py, px, co, zp, yp, xp).
    """
    f1_scr = refs[-1]
    o_ref = refs[-2]

    idx = 0
    patch_ref, w1t_ref, b1_ref = refs[0], refs[1], refs[2]
    idx = 3
    dense_refs = []
    for _ in dense_meta:
        dense_refs.append((refs[idx], refs[idx + 1]))
        idx += 2
    mlp_refs = []
    for _ in range(n_hid):
        mlp_refs.append(tuple(refs[idx:idx + 4]))
        idx += 4
    fow_ref, fob_ref = refs[idx], refs[idx + 1]

    # ---- conv layer 1: ONE MXU dot over the im2col slab (transposed so the
    #      positions axis is lane-dense), then bias + LeakyReLU + MaxPool3d.
    z1 = jnp.dot(w1t_ref[...], patch_ref[...],
                 preferred_element_type=jnp.float32)        # (c1, m1^3 * n*p1)
    z1 = z1 + b1_ref[...]                                    # bias: (c1, 1) lane bcast
    z1 = _leaky(z1)
    np1 = n * p1
    a1 = z1[:, 0:np1]
    for wslot in range(1, m1_3):                             # MaxPool3d: static lane slices
        a1 = jnp.maximum(a1, z1[:, wslot * np1:(wslot + 1) * np1])
    # a1: (c1, n*p1), columns ordered (sample, pooled position)

    # ---- re-pack to per-sample feature rows (n, c1*p1) in PyTorch
    #      x.view(N, -1) order (c, z, y, x) via a tiny VMEM scratch
    #      (avoids an in-vreg sublane->lane relayout).
    for n0 in range(n):
        for ci in range(c1):
            f1_scr[n0:n0 + 1, ci * p1:(ci + 1) * p1] = \
                a1[ci:ci + 1, n0 * p1:(n0 + 1) * p1]
    h = f1_scr[...]                                          # (n, c1*p1)

    # ---- deeper conv layers, densified into single matmuls.
    for (wd_ref, bd_ref), (m3, grp) in zip(dense_refs, dense_meta):
        z = jnp.dot(h, wd_ref[...], preferred_element_type=jnp.float32)
        z = _leaky(z + bd_ref[...])
        a = z[:, 0:grp]
        for wslot in range(1, m3):                           # MaxPool3d over window slots
            a = jnp.maximum(a, z[:, wslot * grp:(wslot + 1) * grp])
        h = a                                                # (n, grp) in (c, z, y, x) order

    # ---- MLP head: [Linear -> BatchNorm1d(train) -> LeakyReLU] x n_hid -> Linear
    for (fw_ref, fb_ref, bg_ref, bb_ref) in mlp_refs:
        z = jnp.dot(h, fw_ref[...], preferred_element_type=jnp.float32) + fb_ref[...]
        mu = jnp.mean(z, axis=0, keepdims=True)
        var = jnp.mean((z - mu) * (z - mu), axis=0, keepdims=True)   # biased (train mode)
        zh = (z - mu) * jax.lax.rsqrt(var + BN_EPS)
        y = bg_ref[...] * zh + bb_ref[...]
        h = _leaky(y)
        # TODO(synk): torch.nn.Dropout is stochastic in train mode; the
        # configured dropout_rate is 0.0 so identity is exact here.
    out = jnp.dot(h, fow_ref[...], preferred_element_type=jnp.float32) + fob_ref[...]
    o_ref[...] = out.astype(o_ref.dtype)


# --------------------------------------------------------------------------
# Wrapper-side operand preparation
# --------------------------------------------------------------------------
def build_patch1_t(x, k, s, m):
    """im2col of the raw input for conv layer 1, already transposed.

    x : (N, Cin, D, H, W) f32
    returns (Cin*k^3, m^3 * N * Dp*Hp*Wp) with rows ordered (ci, dz, dy, dx)
    and columns ordered (pz, py, px, n, zp, yp, xp), where the conv output
    position is (zp*m+pz, yp*m+py, xp*m+px) -> pool windows are contiguous
    column blocks of width N*Dp*Hp*Wp.
    """
    N, Ci, D, H, W = x.shape
    do, ho, wo = (D - k) // s + 1, (H - k) // s + 1, (W - k) // s + 1
    dp, hp, wp = do // m, ho // m, wo // m
    taps = []
    for dz in range(k):
        for dy in range(k):
            for dx in range(k):
                sl = x[:, :,
                       dz:dz + (do - 1) * s + 1:s,
                       dy:dy + (ho - 1) * s + 1:s,
                       dx:dx + (wo - 1) * s + 1:s]        # (N, Ci, do, ho, wo)
                taps.append(sl[:, :, :dp * m, :hp * m, :wp * m])
    pat = jnp.stack(taps, axis=0)                          # (k^3, N, Ci, dp*m, hp*m, wp*m)
    pat = pat.reshape(k ** 3, N, Ci, dp, m, hp, m, wp, m)
    #            (Ci, k^3, pz, py, px, N,  zp, yp, xp)
    pat = jnp.transpose(pat, (2, 0, 4, 6, 8, 1, 3, 5, 7))
    pat = pat.reshape(Ci * k ** 3, (m ** 3) * N * dp * hp * wp)
    k1 = Ci * k ** 3
    k1p = _round_up(k1, 8)
    if k1p != k1:
        pat = jnp.pad(pat, ((0, k1p - k1), (0, 0)))
    return pat


def _conv_pool_out_dims(dims, k, s, m):
    return tuple((((d - k) // s + 1) // m) for d in dims)


def _densify_conv(w, b, in_dims, k, s, m):
    """Fold a Conv3d (+ MaxPool grouping) into a dense (F_in, Q) matrix.

    Input feature order (ci, z, y, x); output columns (pz, py, px, co, zp, yp, xp)
    so that maxing over the m^3 leading column groups performs MaxPool3d and the
    pooled result is in PyTorch x.view(N,-1) flatten order (co, zp, yp, xp).
    """
    w = np.asarray(w, np.float32)
    b = np.asarray(b, np.float32)
    cout, cin = w.shape[0], w.shape[1]
    D, H, W = in_dims
    do, ho, wo = (D - k) // s + 1, (H - k) // s + 1, (W - k) // s + 1
    dp, hp, wp = do // m, ho // m, wo // m
    f_in = cin * D * H * W
    grp = cout * dp * hp * wp
    q_tot = (m ** 3) * grp
    mat = np.zeros((f_in, q_tot), np.float32)
    bias = np.zeros((q_tot,), np.float32)
    for pz in range(m):
        for py in range(m):
            for px in range(m):
                wslot = (pz * m + py) * m + px
                for co in range(cout):
                    for zp in range(dp):
                        for yp in range(hp):
                            for xp in range(wp):
                                q = wslot * grp + ((co * dp + zp) * hp + yp) * wp + xp
                                bias[q] = b[co]
                                z0 = (zp * m + pz) * s
                                y0 = (yp * m + py) * s
                                x0 = (xp * m + px) * s
                                for ci in range(cin):
                                    for dz in range(k):
                                        for dy in range(k):
                                            for dx in range(k):
                                                r = ((ci * D + z0 + dz) * H + y0 + dy) * W + x0 + dx
                                                mat[r, q] = w[co, ci, dz, dy, dx]
    return mat, bias.reshape(1, q_tot), (dp, hp, wp)


# --------------------------------------------------------------------------
# Full forward pass (mirrors CNN.forward)
# --------------------------------------------------------------------------
def cnn_forward(x_ncdhw, packed, *, params, output_dim):
    ks = params['conv_kernels']
    ss = params['conv_strides']
    ms = params['maxpool_kernels']
    n_channs = params['n_channs']
    n_hid = len(params['n_hid_nodes'])

    n = x_ncdhw.shape[0]
    input_dim = tuple(x_ncdhw.shape[2:])

    # conv layer 1 im2col slab (tiny: raw input expanded k^3-fold, ~100 KB)
    patch1t = build_patch1_t(x_ncdhw.astype(jnp.float32), ks[0], ss[0], ms[0])

    dims = _conv_pool_out_dims(input_dim, ks[0], ss[0], ms[0])
    c1 = n_channs[0]
    p1 = dims[0] * dims[1] * dims[2]

    dense_meta = []
    for i in range(1, len(ks)):
        dims = _conv_pool_out_dims(dims, ks[i], ss[i], ms[i])
        dense_meta.append((ms[i] ** 3, n_channs[i] * dims[0] * dims[1] * dims[2]))

    args = [patch1t, packed['w1t'], packed['b1']]
    for i in range(1, len(ks)):
        args += [packed[f'dense{i}_w'], packed[f'dense{i}_b']]
    for i in range(n_hid):
        args += [packed[f'fc{i}_w'], packed[f'fc{i}_b'],
                 packed[f'bn{i}_g'], packed[f'bn{i}_b']]
    args += [packed['fc_out_w'], packed['fc_out_b']]

    out_pad = packed['fc_out_w'].shape[1]
    vmem = pl.BlockSpec(memory_space=pltpu.MemorySpace.VMEM)
    out = pl.pallas_call(
        functools.partial(cnn_fused_kernel, n=n, c1=c1, p1=p1, m1_3=ms[0] ** 3,
                          dense_meta=tuple(dense_meta), n_hid=n_hid),
        out_shape=jax.ShapeDtypeStruct((n, out_pad), jnp.float32),
        in_specs=[vmem] * len(args),
        out_specs=vmem,
        scratch_shapes=[pltpu.VMEM((n, c1 * p1), jnp.float32)],
    )(*args)
    return out[:, :output_dim]        # drop output lane padding


# --------------------------------------------------------------------------
# Weight packing: PyTorch-layout weights -> kernel-ready operands
# --------------------------------------------------------------------------
def pack_weights(weights, params, input_dim):
    packed = {}
    ks = params['conv_kernels']
    ss = params['conv_strides']
    ms = params['maxpool_kernels']

    # conv layer 1: (Cout, Cin, k, k, k) -> (Cout, Cin*k^3), K padded to mult of 8
    w0 = np.asarray(weights['conv0_w'], np.float32)
    c1, cin = w0.shape[0], w0.shape[1]
    k1 = cin * ks[0] ** 3
    k1p = _round_up(k1, 8)
    w1t = np.zeros((c1, k1p), np.float32)
    w1t[:, :k1] = w0.reshape(c1, k1)
    packed['w1t'] = jnp.asarray(w1t)
    packed['b1'] = jnp.asarray(
        np.asarray(weights['conv0_b'], np.float32).reshape(c1, 1))

    # deeper conv layers, densified
    dims = _conv_pool_out_dims(input_dim, ks[0], ss[0], ms[0])
    for i in range(1, len(ks)):
        mat, bq, dims = _densify_conv(weights[f'conv{i}_w'], weights[f'conv{i}_b'],
                                      dims, ks[i], ss[i], ms[i])
        packed[f'dense{i}_w'] = jnp.asarray(mat)
        packed[f'dense{i}_b'] = jnp.asarray(bq)

    # MLP head (PyTorch Linear weight is (out, in); kernel wants (in, out))
    n_hid_nodes = params['n_hid_nodes']
    for i, h in enumerate(n_hid_nodes):
        packed[f'fc{i}_w'] = jnp.asarray(
            np.asarray(weights[f'fc{i}_w'], np.float32).T)
        packed[f'fc{i}_b'] = jnp.asarray(
            np.asarray(weights[f'fc{i}_b'], np.float32).reshape(1, h))
        packed[f'bn{i}_g'] = jnp.asarray(
            np.asarray(weights[f'bn{i}_gamma'], np.float32).reshape(1, h))
        packed[f'bn{i}_b'] = jnp.asarray(
            np.asarray(weights[f'bn{i}_beta'], np.float32).reshape(1, h))

    wout = np.asarray(weights['fc_out_w'], np.float32).T      # (in, out)
    bout = np.asarray(weights['fc_out_b'], np.float32)
    out_dim = wout.shape[1]
    out_pad = _round_up(out_dim, 8)
    packed['fc_out_w'] = jnp.asarray(
        np.pad(wout, ((0, 0), (0, out_pad - out_dim))))
    packed['fc_out_b'] = jnp.asarray(
        np.pad(bout, (0, out_pad - out_dim)).reshape(1, out_pad))
    return packed


# --------------------------------------------------------------------------
# Deterministic synthetic parameters (PyTorch-layout shapes from CNN.__init__)
# --------------------------------------------------------------------------
def init_weights(key, params, input_dim, output_dim):
    weights = {}
    keys = iter(jax.random.split(key, 64))

    def normal(shape, scale):
        return scale * jax.random.normal(next(keys), shape, dtype=jnp.float32)

    n_channs = params['n_channs']
    ks = params['conv_kernels']
    ss = params['conv_strides']
    ms = params['maxpool_kernels']

    dims = list(input_dim)
    in_c = 1
    for i, (k, s, m, out_c) in enumerate(zip(ks, ss, ms, n_channs)):
        fan_in = in_c * k * k * k
        weights[f'conv{i}_w'] = normal((out_c, in_c, k, k, k), (2.0 / fan_in) ** 0.5)
        weights[f'conv{i}_b'] = normal((out_c,), 0.01)
        dims = [(((d - k) // s + 1) // m) for d in dims]
        in_c = out_c

    flat_dim = dims[0] * dims[1] * dims[2] * n_channs[-1]
    n_hid_nodes = params['n_hid_nodes']
    prev = flat_dim
    gain = (2.0 / (1.0 + NEG_SLOPE ** 2)) ** 0.5
    for i, h in enumerate(n_hid_nodes):
        # kaiming_normal_(fan_in, leaky_relu)-style synthetic init, PyTorch (out, in)
        weights[f'fc{i}_w'] = normal((h, prev), gain / (prev ** 0.5))
        weights[f'fc{i}_b'] = normal((h,), 0.01)
        weights[f'bn{i}_gamma'] = jnp.ones((h,), jnp.float32)
        weights[f'bn{i}_beta'] = jnp.zeros((h,), jnp.float32)
        prev = h

    weights['fc_out_w'] = normal((output_dim, prev), gain / (prev ** 0.5))
    weights['fc_out_b'] = normal((output_dim,), 0.01)
    return weights


# --------------------------------------------------------------------------
if __name__ == "__main__":
    params = {
        'n_channs': [4, 8],
        'conv_kernels': [3, 3],
        'conv_strides': [1, 1],
        'maxpool_kernels': [2, 2],
        'n_hid_nodes': [32, 32],
        'dropout_rate': [0.0, 0.0],
    }
    input_dim = (10, 10, 10)
    output_dim = 5
    batch = 2

    key = jax.random.PRNGKey(0)
    k_w, k_x = jax.random.split(key)
    weights = init_weights(k_w, params, input_dim, output_dim)
    packed = pack_weights(weights, params, input_dim)

    # PyTorch-style NCDHW input with a single input channel
    x = jax.random.normal(k_x, (batch, 1) + input_dim, dtype=jnp.float32)

    fwd = jax.jit(functools.partial(cnn_forward, params=params, output_dim=output_dim))
    out = jax.block_until_ready(fwd(x, packed))
    assert out.shape == (batch, output_dim), out.shape
    print("KERNEL_OK")
</pallas_src>

<mosaic_0001>
module attributes {stable_mosaic.version = 11 : i64} {
  func.func @cnn_fused_kernel(%arg0: memref<32x1024xf32, #tpu.memory_space<vmem>>, %arg1: memref<4x32xf32, #tpu.memory_space<vmem>>, %arg2: memref<4x1xf32, #tpu.memory_space<vmem>>, %arg3: memref<256x64xf32, #tpu.memory_space<vmem>>, %arg4: memref<1x64xf32, #tpu.memory_space<vmem>>, %arg5: memref<8x32xf32, #tpu.memory_space<vmem>>, %arg6: memref<1x32xf32, #tpu.memory_space<vmem>>, %arg7: memref<1x32xf32, #tpu.memory_space<vmem>>, %arg8: memref<1x32xf32, #tpu.memory_space<vmem>>, %arg9: memref<32x32xf32, #tpu.memory_space<vmem>>, %arg10: memref<1x32xf32, #tpu.memory_space<vmem>>, %arg11: memref<1x32xf32, #tpu.memory_space<vmem>>, %arg12: memref<1x32xf32, #tpu.memory_space<vmem>>, %arg13: memref<32x8xf32, #tpu.memory_space<vmem>>, %arg14: memref<1x8xf32, #tpu.memory_space<vmem>>, %arg15: memref<2x8xf32, #tpu.memory_space<vmem>>, %arg16: memref<2x256xf32, #tpu.memory_space<vmem>>) attributes {dimension_semantics = [], scalar_prefetch = 0 : i64, scratch_operands = 1 : i64, tpu.core_type = #tpu.core_type<tc>} {
    %c0 = arith.constant 0 : index
    %c0_0 = arith.constant 0 : index
    %0 = vector.load %arg1[%c0, %c0_0] : memref<4x32xf32, #tpu.memory_space<vmem>>, vector<4x32xf32>
    %c0_1 = arith.constant 0 : index
    %c0_2 = arith.constant 0 : index
    %1 = vector.load %arg0[%c0_1, %c0_2] : memref<32x1024xf32, #tpu.memory_space<vmem>>, vector<32x1024xf32>
    %cst = arith.constant dense<0.000000e+00> : vector<4x1024xf32>
    %2 = tpu.matmul %0, %1, %cst {dimension_numbers = #tpu.dot_dimension_numbers<[1], [0], [0], [1], [0, 0, 1, 1], [], []>} : vector<4x32xf32>, vector<32x1024xf32>, vector<4x1024xf32> -> vector<4x1024xf32>
    %c0_3 = arith.constant 0 : index
    %c0_4 = arith.constant 0 : index
    %3 = vector.load %arg2[%c0_3, %c0_4] : memref<4x1xf32, #tpu.memory_space<vmem>>, vector<4x1xf32>
    %4 = vector.broadcast %3 : vector<4x1xf32> to vector<4x1024xf32>
    %5 = arith.addf %2, %4 : vector<4x1024xf32>
    %cst_5 = arith.constant 0.000000e+00 : f32
    %6 = vector.broadcast %cst_5 : f32 to vector<4x1024xf32>
    %7 = arith.cmpf oge, %5, %6 : vector<4x1024xf32>
    %cst_6 = arith.constant 0.00999999977 : f32
    %8 = vector.broadcast %cst_6 : f32 to vector<4x1024xf32>
    %9 = arith.mulf %8, %5 : vector<4x1024xf32>
    %10 = arith.select %7, %5, %9 : vector<4x1024xi1>, vector<4x1024xf32>
    %11 = vector.extract_strided_slice %10 {offsets = [0, 0], sizes = [4, 128], strides = [1, 1]} : vector<4x1024xf32> to vector<4x128xf32>
    %12 = vector.extract_strided_slice %10 {offsets = [0, 128], sizes = [4, 128], strides = [1, 1]} : vector<4x1024xf32> to vector<4x128xf32>
    %13 = arith.maximumf %11, %12 : vector<4x128xf32>
    %14 = vector.extract_strided_slice %10 {offsets = [0, 256], sizes = [4, 128], strides = [1, 1]} : vector<4x1024xf32> to vector<4x128xf32>
    %15 = arith.maximumf %13, %14 : vector<4x128xf32>
    %16 = vector.extract_strided_slice %10 {offsets = [0, 384], sizes = [4, 128], strides = [1, 1]} : vector<4x1024xf32> to vector<4x128xf32>
    %17 = arith.maximumf %15, %16 : vector<4x128xf32>
    %18 = vector.extract_strided_slice %10 {offsets = [0, 512], sizes = [4, 128], strides = [1, 1]} : vector<4x1024xf32> to vector<4x128xf32>
    %19 = arith.maximumf %17, %18 : vector<4x128xf32>
    %20 = vector.extract_strided_slice %10 {offsets = [0, 640], sizes = [4, 128], strides = [1, 1]} : vector<4x1024xf32> to vector<4x128xf32>
    %21 = arith.maximumf %19, %20 : vector<4x128xf32>
    %22 = vector.extract_strided_slice %10 {offsets = [0, 768], sizes = [4, 128], strides = [1, 1]} : vector<4x1024xf32> to vector<4x128xf32>
    %23 = arith.maximumf %21, %22 : vector<4x128xf32>
    %24 = vector.extract_strided_slice %10 {offsets = [0, 896], sizes = [4, 128], strides = [1, 1]} : vector<4x1024xf32> to vector<4x128xf32>
    %25 = arith.maximumf %23, %24 : vector<4x128xf32>
    %26 = vector.extract_strided_slice %25 {offsets = [0, 0], sizes = [1, 64], strides = [1, 1]} : vector<4x128xf32> to vector<1x64xf32>
    %c0_7 = arith.constant 0 : index
    %c0_8 = arith.constant 0 : index
    %27 = vector.load %arg16[%c0_7, %c0_8] : memref<2x256xf32, #tpu.memory_space<vmem>>, vector<1x64xf32>
    tpu.vector_store %arg16[%c0_7, %c0_8], %26 {strides = array<i32>} : memref<2x256xf32, #tpu.memory_space<vmem>>, vector<1x64xf32>,
    %28 = vector.extract_strided_slice %25 {offsets = [1, 0], sizes = [1, 64], strides = [1, 1]} : vector<4x128xf32> to vector<1x64xf32>
    %c0_9 = arith.constant 0 : index
    %c64 = arith.constant 64 : index
    %29 = vector.load %arg16[%c0_9, %c64] : memref<2x256xf32, #tpu.memory_space<vmem>>, vector<1x64xf32>
    tpu.vector_store %arg16[%c0_9, %c64], %28 {strides = array<i32>} : memref<2x256xf32, #tpu.memory_space<vmem>>, vector<1x64xf32>,
    %30 = vector.extract_strided_slice %25 {offsets = [2, 0], sizes = [1, 64], strides = [1, 1]} : vector<4x128xf32> to vector<1x64xf32>
    %c0_10 = arith.constant 0 : index
    %c128 = arith.constant 128 : index
    %31 = vector.load %arg16[%c0_10, %c128] : memref<2x256xf32, #tpu.memory_space<vmem>>, vector<1x64xf32>
    tpu.vector_store %arg16[%c0_10, %c128], %30 {strides = array<i32>} : memref<2x256xf32, #tpu.memory_space<vmem>>, vector<1x64xf32>,
    %32 = vector.extract_strided_slice %25 {offsets = [3, 0], sizes = [1, 64], strides = [1, 1]} : vector<4x128xf32> to vector<1x64xf32>
    %c0_11 = arith.constant 0 : index
    %c192 = arith.constant 192 : index
    %33 = vector.load %arg16[%c0_11, %c192] : memref<2x256xf32, #tpu.memory_space<vmem>>, vector<1x64xf32>
    tpu.vector_store %arg16[%c0_11, %c192], %32 {strides = array<i32>} : memref<2x256xf32, #tpu.memory_space<vmem>>, vector<1x64xf32>,
    %34 = vector.extract_strided_slice %25 {offsets = [0, 64], sizes = [1, 64], strides = [1, 1]} : vector<4x128xf32> to vector<1x64xf32>
    %c1 = arith.constant 1 : index
    %c0_12 = arith.constant 0 : index
    %35 = vector.load %arg16[%c1, %c0_12] : memref<2x256xf32, #tpu.memory_space<vmem>>, vector<1x64xf32>
    tpu.vector_store %arg16[%c1, %c0_12], %34 {strides = array<i32>} : memref<2x256xf32, #tpu.memory_space<vmem>>, vector<1x64xf32>,
    %36 = vector.extract_strided_slice %25 {offsets = [1, 64], sizes = [1, 64], strides = [1, 1]} : vector<4x128xf32> to vector<1x64xf32>
    %c1_13 = arith.constant 1 : index
    %c64_14 = arith.constant 64 : index
    %37 = vector.load %arg16[%c1_13, %c64_14] : memref<2x256xf32, #tpu.memory_space<vmem>>, vector<1x64xf32>
    tpu.vector_store %arg16[%c1_13, %c64_14], %36 {strides = array<i32>} : memref<2x256xf32, #tpu.memory_space<vmem>>, vector<1x64xf32>,
    %38 = vector.extract_strided_slice %25 {offsets = [2, 64], sizes = [1, 64], strides = [1, 1]} : vector<4x128xf32> to vector<1x64xf32>
    %c1_15 = arith.constant 1 : index
    %c128_16 = arith.constant 128 : index
    %39 = vector.load %arg16[%c1_15, %c128_16] : memref<2x256xf32, #tpu.memory_space<vmem>>, vector<1x64xf32>
    tpu.vector_store %arg16[%c1_15, %c128_16], %38 {strides = array<i32>} : memref<2x256xf32, #tpu.memory_space<vmem>>, vector<1x64xf32>,
    %40 = vector.extract_strided_slice %25 {offsets = [3, 64], sizes = [1, 64], strides = [1, 1]} : vector<4x128xf32> to vector<1x64xf32>
    %c1_17 = arith.constant 1 : index
    %c192_18 = arith.constant 192 : index
    %41 = vector.load %arg16[%c1_17, %c192_18] : memref<2x256xf32, #tpu.memory_space<vmem>>, vector<1x64xf32>
    tpu.vector_store %arg16[%c1_17, %c192_18], %40 {strides = array<i32>} : memref<2x256xf32, #tpu.memory_space<vmem>>, vector<1x64xf32>,
    %c0_19 = arith.constant 0 : index
    %c0_20 = arith.constant 0 : index
    %42 = vector.load %arg16[%c0_19, %c0_20] : memref<2x256xf32, #tpu.memory_space<vmem>>, vector<2x256xf32>
    %c0_21 = arith.constant 0 : index
    %c0_22 = arith.constant 0 : index
    %43 = vector.load %arg3[%c0_21, %c0_22] : memref<256x64xf32, #tpu.memory_space<vmem>>, vector<256x64xf32>
    %cst_23 = arith.constant dense<0.000000e+00> : vector<2x64xf32>
    %44 = tpu.matmul %42, %43, %cst_23 {dimension_numbers = #tpu.dot_dimension_numbers<[1], [0], [0], [1], [0, 0, 1, 1], [], []>} : vector<2x256xf32>, vector<256x64xf32>, vector<2x64xf32> -> vector<2x64xf32>
    %c0_24 = arith.constant 0 : index
    %c0_25 = arith.constant 0 : index
    %45 = vector.load %arg4[%c0_24, %c0_25] : memref<1x64xf32, #tpu.memory_space<vmem>>, vector<1x64xf32>
    %46 = vector.broadcast %45 : vector<1x64xf32> to vector<2x64xf32>
    %47 = arith.addf %44, %46 : vector<2x64xf32>
    %cst_26 = arith.constant 0.000000e+00 : f32
    %48 = vector.broadcast %cst_26 : f32 to vector<2x64xf32>
    %49 = arith.cmpf oge, %47, %48 : vector<2x64xf32>
    %cst_27 = arith.constant 0.00999999977 : f32
    %50 = vector.broadcast %cst_27 : f32 to vector<2x64xf32>
    %51 = arith.mulf %50, %47 : vector<2x64xf32>
    %52 = arith.select %49, %47, %51 : vector<2x64xi1>, vector<2x64xf32>
    %53 = vector.extract_strided_slice %52 {offsets = [0, 0], sizes = [2, 8], strides = [1, 1]} : vector<2x64xf32> to vector<2x8xf32>
    %54 = vector.extract_strided_slice %52 {offsets = [0, 8], sizes = [2, 8], strides = [1, 1]} : vector<2x64xf32> to vector<2x8xf32>
    %55 = arith.maximumf %53, %54 : vector<2x8xf32>
    %56 = vector.extract_strided_slice %52 {offsets = [0, 16], sizes = [2, 8], strides = [1, 1]} : vector<2x64xf32> to vector<2x8xf32>
    %57 = arith.maximumf %55, %56 : vector<2x8xf32>
    %58 = vector.extract_strided_slice %52 {offsets = [0, 24], sizes = [2, 8], strides = [1, 1]} : vector<2x64xf32> to vector<2x8xf32>
    %59 = arith.maximumf %57, %58 : vector<2x8xf32>
    %60 = vector.extract_strided_slice %52 {offsets = [0, 32], sizes = [2, 8], strides = [1, 1]} : vector<2x64xf32> to vector<2x8xf32>
    %61 = arith.maximumf %59, %60 : vector<2x8xf32>
    %62 = vector.extract_strided_slice %52 {offsets = [0, 40], sizes = [2, 8], strides = [1, 1]} : vector<2x64xf32> to vector<2x8xf32>
    %63 = arith.maximumf %61, %62 : vector<2x8xf32>
    %64 = vector.extract_strided_slice %52 {offsets = [0, 48], sizes = [2, 8], strides = [1, 1]} : vector<2x64xf32> to vector<2x8xf32>
    %65 = arith.maximumf %63, %64 : vector<2x8xf32>
    %66 = vector.extract_strided_slice %52 {offsets = [0, 56], sizes = [2, 8], strides = [1, 1]} : vector<2x64xf32> to vector<2x8xf32>
    %67 = arith.maximumf %65, %66 : vector<2x8xf32>
    %c0_28 = arith.constant 0 : index
    %c0_29 = arith.constant 0 : index
    %68 = vector.load %arg5[%c0_28, %c0_29] : memref<8x32xf32, #tpu.memory_space<vmem>>, vector<8x32xf32>
    %cst_30 = arith.constant dense<0.000000e+00> : vector<2x32xf32>
    %69 = tpu.matmul %67, %68, %cst_30 {dimension_numbers = #tpu.dot_dimension_numbers<[1], [0], [0], [1], [0, 0, 1, 1], [], []>} : vector<2x8xf32>, vector<8x32xf32>, vector<2x32xf32> -> vector<2x32xf32>
    %c0_31 = arith.constant 0 : index
    %c0_32 = arith.constant 0 : index
    %70 = vector.load %arg6[%c0_31, %c0_32] : memref<1x32xf32, #tpu.memory_space<vmem>>, vector<1x32xf32>
    %71 = vector.broadcast %70 : vector<1x32xf32> to vector<2x32xf32>
    %72 = arith.addf %69, %71 : vector<2x32xf32>
    %cst_33 = arith.constant dense<0.000000e+00> : vector<32xf32>
    %73 = vector.multi_reduction <add>, %72, %cst_33 [0] : vector<2x32xf32> to vector<32xf32>
    %74 = vector.shape_cast %73 : vector<32xf32> to vector<1x32xf32>
    %cst_34 = arith.constant 2.000000e+00 : f32
    %75 = vector.broadcast %cst_34 : f32 to vector<1x32xf32>
    %76 = arith.divf %74, %75 : vector<1x32xf32>
    %77 = vector.broadcast %76 : vector<1x32xf32> to vector<2x32xf32>
    %78 = arith.subf %72, %77 : vector<2x32xf32>
    %79 = vector.broadcast %76 : vector<1x32xf32> to vector<2x32xf32>
    %80 = arith.subf %72, %79 : vector<2x32xf32>
    %81 = arith.mulf %78, %80 : vector<2x32xf32>
    %cst_35 = arith.constant dense<0.000000e+00> : vector<32xf32>
    %82 = vector.multi_reduction <add>, %81, %cst_35 [0] : vector<2x32xf32> to vector<32xf32>
    %83 = vector.shape_cast %82 : vector<32xf32> to vector<1x32xf32>
    %cst_36 = arith.constant 2.000000e+00 : f32
    %84 = vector.broadcast %cst_36 : f32 to vector<1x32xf32>
    %85 = arith.divf %83, %84 : vector<1x32xf32>
    %86 = vector.broadcast %76 : vector<1x32xf32> to vector<2x32xf32>
    %87 = arith.subf %72, %86 : vector<2x32xf32>
    %cst_37 = arith.constant 9.99999974E-6 : f32
    %88 = vector.broadcast %cst_37 : f32 to vector<1x32xf32>
    %89 = arith.addf %85, %88 : vector<1x32xf32>
    %90 = math.rsqrt %89 : vector<1x32xf32>
    %91 = vector.broadcast %90 : vector<1x32xf32> to vector<2x32xf32>
    %92 = arith.mulf %87, %91 : vector<2x32xf32>
    %c0_38 = arith.constant 0 : index
    %c0_39 = arith.constant 0 : index
    %93 = vector.load %arg7[%c0_38, %c0_39] : memref<1x32xf32, #tpu.memory_space<vmem>>, vector<1x32xf32>
    %94 = vector.broadcast %93 : vector<1x32xf32> to vector<2x32xf32>
    %95 = arith.mulf %94, %92 : vector<2x32xf32>
    %c0_40 = arith.constant 0 : index
    %c0_41 = arith.constant 0 : index
    %96 = vector.load %arg8[%c0_40, %c0_41] : memref<1x32xf32, #tpu.memory_space<vmem>>, vector<1x32xf32>
    %97 = vector.broadcast %96 : vector<1x32xf32> to vector<2x32xf32>
    %98 = arith.addf %95, %97 : vector<2x32xf32>
    %cst_42 = arith.constant 0.000000e+00 : f32
    %99 = vector.broadcast %cst_42 : f32 to vector<2x32xf32>
    %100 = arith.cmpf oge, %98, %99 : vector<2x32xf32>
    %cst_43 = arith.constant 0.00999999977 : f32
    %101 = vector.broadcast %cst_43 : f32 to vector<2x32xf32>
    %102 = arith.mulf %101, %98 : vector<2x32xf32>
    %103 = arith.select %100, %98, %102 : vector<2x32xi1>, vector<2x32xf32>
    %c0_44 = arith.constant 0 : index
    %c0_45 = arith.constant 0 : index
    %104 = vector.load %arg9[%c0_44, %c0_45] : memref<32x32xf32, #tpu.memory_space<vmem>>, vector<32x32xf32>
    %cst_46 = arith.constant dense<0.000000e+00> : vector<2x32xf32>
    %105 = tpu.matmul %103, %104, %cst_46 {dimension_numbers = #tpu.dot_dimension_numbers<[1], [0], [0], [1], [0, 0, 1, 1], [], []>} : vector<2x32xf32>, vector<32x32xf32>, vector<2x32xf32> -> vector<2x32xf32>
    %c0_47 = arith.constant 0 : index
    %c0_48 = arith.constant 0 : index
    %106 = vector.load %arg10[%c0_47, %c0_48] : memref<1x32xf32, #tpu.memory_space<vmem>>, vector<1x32xf32>
    %107 = vector.broadcast %106 : vector<1x32xf32> to vector<2x32xf32>
    %108 = arith.addf %105, %107 : vector<2x32xf32>
    %cst_49 = arith.constant dense<0.000000e+00> : vector<32xf32>
    %109 = vector.multi_reduction <add>, %108, %cst_49 [0] : vector<2x32xf32> to vector<32xf32>
    %110 = vector.shape_cast %109 : vector<32xf32> to vector<1x32xf32>
    %cst_50 = arith.constant 2.000000e+00 : f32
    %111 = vector.broadcast %cst_50 : f32 to vector<1x32xf32>
    %112 = arith.divf %110, %111 : vector<1x32xf32>
    %113 = vector.broadcast %112 : vector<1x32xf32> to vector<2x32xf32>
    %114 = arith.subf %108, %113 : vector<2x32xf32>
    %115 = vector.broadcast %112 : vector<1x32xf32> to vector<2x32xf32>
    %116 = arith.subf %108, %115 : vector<2x32xf32>
    %117 = arith.mulf %114, %116 : vector<2x32xf32>
    %cst_51 = arith.constant dense<0.000000e+00> : vector<32xf32>
    %118 = vector.multi_reduction <add>, %117, %cst_51 [0] : vector<2x32xf32> to vector<32xf32>
    %119 = vector.shape_cast %118 : vector<32xf32> to vector<1x32xf32>
    %cst_52 = arith.constant 2.000000e+00 : f32
    %120 = vector.broadcast %cst_52 : f32 to vector<1x32xf32>
    %121 = arith.divf %119, %120 : vector<1x32xf32>
    %122 = vector.broadcast %112 : vector<1x32xf32> to vector<2x32xf32>
    %123 = arith.subf %108, %122 : vector<2x32xf32>
    %cst_53 = arith.constant 9.99999974E-6 : f32
    %124 = vector.broadcast %cst_53 : f32 to vector<1x32xf32>
    %125 = arith.addf %121, %124 : vector<1x32xf32>
    %126 = math.rsqrt %125 : vector<1x32xf32>
    %127 = vector.broadcast %126 : vector<1x32xf32> to vector<2x32xf32>
    %128 = arith.mulf %123, %127 : vector<2x32xf32>
    %c0_54 = arith.constant 0 : index
    %c0_55 = arith.constant 0 : index
    %129 = vector.load %arg11[%c0_54, %c0_55] : memref<1x32xf32, #tpu.memory_space<vmem>>, vector<1x32xf32>
    %130 = vector.broadcast %129 : vector<1x32xf32> to vector<2x32xf32>
    %131 = arith.mulf %130, %128 : vector<2x32xf32>
    %c0_56 = arith.constant 0 : index
    %c0_57 = arith.constant 0 : index
    %132 = vector.load %arg12[%c0_56, %c0_57] : memref<1x32xf32, #tpu.memory_space<vmem>>, vector<1x32xf32>
    %133 = vector.broadcast %132 : vector<1x32xf32> to vector<2x32xf32>
    %134 = arith.addf %131, %133 : vector<2x32xf32>
    %cst_58 = arith.constant 0.000000e+00 : f32
    %135 = vector.broadcast %cst_58 : f32 to vector<2x32xf32>
    %136 = arith.cmpf oge, %134, %135 : vector<2x32xf32>
    %cst_59 = arith.constant 0.00999999977 : f32
    %137 = vector.broadcast %cst_59 : f32 to vector<2x32xf32>
    %138 = arith.mulf %137, %134 : vector<2x32xf32>
    %139 = arith.select %136, %134, %138 : vector<2x32xi1>, vector<2x32xf32>
    %c0_60 = arith.constant 0 : index
    %c0_61 = arith.constant 0 : index
    %140 = vector.load %arg13[%c0_60, %c0_61] : memref<32x8xf32, #tpu.memory_space<vmem>>, vector<32x8xf32>
    %cst_62 = arith.constant dense<0.000000e+00> : vector<2x8xf32>
    %141 = tpu.matmul %139, %140, %cst_62 {dimension_numbers = #tpu.dot_dimension_numbers<[1], [0], [0], [1], [0, 0, 1, 1], [], []>} : vector<2x32xf32>, vector<32x8xf32>, vector<2x8xf32> -> vector<2x8xf32>
    %c0_63 = arith.constant 0 : index
    %c0_64 = arith.constant 0 : index
    %142 = vector.load %arg14[%c0_63, %c0_64] : memref<1x8xf32, #tpu.memory_space<vmem>>, vector<1x8xf32>
    %143 = vector.broadcast %142 : vector<1x8xf32> to vector<2x8xf32>
    %144 = arith.addf %141, %143 : vector<2x8xf32>
    %c0_65 = arith.constant 0 : index
    %c0_66 = arith.constant 0 : index
    %145 = vector.load %arg15[%c0_65, %c0_66] : memref<2x8xf32, #tpu.memory_space<vmem>>, vector<2x8xf32>
    tpu.vector_store %arg15[%c0_65, %c0_66], %144 {strides = array<i32>} : memref<2x8xf32, #tpu.memory_space<vmem>>, vector<2x8xf32>,
    return
  }
}

</mosaic_0001>

<bundles_post_ra>
// kernel: cnn_forward.1
= control target key start
LH: loop header
LB: loop body
LE: loop exit
PB: predicated region body
PF: predicated region fallthrough
CT: control target
= control target key end

     0   :  { %v1078_v6 = vmov 0.0   ;;  %vm90_vm0 = vcmask 261120   ;;  %s1457_s0 = inlined_call_operand.vmem [shape: f32[32,1024], index: 0, kind: input, shape index: {}]   ;;  %s1458_s1 = inlined_call_operand.vmem [shape: f32[4,32], index: 1, kind: input, shape index: {}]   ;;  %s1459_s2 = inlined_call_operand.vmem [shape: f32[4,1], index: 2, kind: input, shape index: {}]   ;;  %s1460_s3 = inlined_call_operand.vmem [shape: f32[256,64], index: 3, kind: input, shape index: {}]   ;;  %s1461_s4 = inlined_call_operand.vmem [shape: f32[1,64], index: 4, kind: input, shape index: {}]   ;;  %s1462_s5 = inlined_call_operand.vmem [shape: f32[8,32], index: 5, kind: input, shape index: {}]   ;;  %s1463_s6 = inlined_call_operand.vmem [shape: f32[1,32], index: 6, kind: input, shape index: {}]   ;;  %s1464_s7 = inlined_call_operand.vmem [shape: f32[1,32], index: 7, kind: input, shape index: {}]   ;;  %s1465_s8 = inlined_call_operand.vmem [shape: f32[1,32], index: 8, kind: input, shape index: {}]   ;;  %s1466_s9 = inlined_call_operand.vmem [shape: f32[32,32], index: 9, kind: input, shape index: {}]   ;;  %s1467_s10 = inlined_call_operand.vmem [shape: f32[1,32], index: 10, kind: input, shape index: {}]   ;;  %s1468_s11 = inlined_call_operand.vmem [shape: f32[1,32], index: 11, kind: input, shape index: {}]   ;;  %s1469_s12 = inlined_call_operand.vmem [shape: f32[1,32], index: 12, kind: input, shape index: {}]   ;;  %s1470_s13 = inlined_call_operand.vmem [shape: f32[32,8], index: 13, kind: input, shape index: {}]   ;;  %s1471_s14 = inlined_call_operand.vmem [shape: f32[1,8], index: 14, kind: input, shape index: {}]   ;;  %s1472_s15 = inlined_call_operand.hbm [shape: f32[2,8], index: 15, kind: output, shape index: {}]  }
   0x1   :  { %v77_v0 = vld [vmem:[%s1457_s0 + $0xc8] sm:$0xff]  ;;  %v76_v1 = vld [vmem:[%s1457_s0 + $0xc0] sm:$0xff]  ;;  %158 = vmatprep.mubr.f32.mxu1 %v1078_v6  ;;  %v79_v17 = vld [vmem:[%s1457_s0 + $0xd8] sm:$0xff]  ;;  %300 = vmatprep.mubr.f32.mxu0 %v1078_v6 }
   0x2   :  { %v69_v2 = vld [vmem:[%s1457_s0 + $0x88] sm:$0xff]  ;;  %118 = vmatprep.subr.mxu1 %v77_v0  ;;  %v68_v4 = vld [vmem:[%s1457_s0 + $0x80] sm:$0xff]  ;;  %v78_v18 = vld [vmem:[%s1457_s0 + $0xd0] sm:$0xff] }
   0x3   :  { %v81_v3 = vld [vmem:[%s1457_s0 + $0xe8] sm:$0xff]  ;;  %v80_v5 = vld [vmem:[%s1457_s0 + $0xe0] sm:$0xff]  ;;  %119 = vmatpush1.msra.mxu1 %v76_v1  ;;  %v71_v20 = vld [vmem:[%s1457_s0 + $0x98] sm:$0xff] }
   0x4   :  { %260 = vmatprep.subr.mxu0 %v81_v3  ;;  %v61_v7 = vld [vmem:[%s1457_s0 + $0x48] sm:$0xff]  ;;  %120 = vmatprep.subr.mxu1 %v69_v2  ;;  %v60_v9 = vld [vmem:[%s1457_s0 + $0x40] sm:$0xff]  ;;  %v70_v21 = vld [vmem:[%s1457_s0 + $0x90] sm:$0xff] }
   0x5   :  { %v73_v8 = vld [vmem:[%s1457_s0 + $0xa8] sm:$0xff]  ;;  %261 = vmatpush1.msra.mxu0 %v80_v5  ;;  %v72_v10 = vld [vmem:[%s1457_s0 + $0xa0] sm:$0xff]  ;;  %121 = vmatpush1.msra.mxu1 %v68_v4  ;;  %v63_v22 = vld [vmem:[%s1457_s0 + $0x58] sm:$0xff] }
   0x6   :  { %v65_v11 = vld [vmem:[%s1457_s0 + $0x68] sm:$0xff]  ;;  %262 = vmatprep.subr.mxu0 %v73_v8  ;;  %v64_v13 = vld [vmem:[%s1457_s0 + $0x60] sm:$0xff]  ;;  %122 = vmatprep.subr.mxu1 %v61_v7  ;;  %v62_v23 = vld [vmem:[%s1457_s0 + $0x50] sm:$0xff] }
   0x7   :  { %v53_v12 = vld [vmem:[%s1457_s0 + $0x8] sm:$0xff]  ;;  %263 = vmatpush1.msra.mxu0 %v72_v10  ;;  %v52_v14 = vld [vmem:[%s1457_s0] sm:$0xff]  ;;  %123 = vmatpush1.msra.mxu1 %v60_v9 }
   0x8   :  { %v57_v15 = vld [vmem:[%s1457_s0 + $0x28] sm:$0xff]  ;;  %264 = vmatprep.subr.mxu0 %v65_v11  ;;  %v51_v16 = vld [vmem:[%s1458_s1] sm:$0xf]  ;;  %124 = vmatprep.subr.mxu1 %v53_v12 }
   0x9   :  { %265 = vmatpush1.msra.mxu0 %v64_v13  ;;  %v56_v19 = vld [vmem:[%s1457_s0 + $0x20] sm:$0xff]  ;;  %125 = vmatpush1.msra.mxu1 %v52_v14 }
   0xa   :  { %266 = vmatprep.subr.mxu0 %v57_v15  ;;  %948 = vmatmul.mubr.msk.f32.vlgmr.msra.gmra.mxu1 %vm90_vm0, %v51_v16 }
   0xb   :  { %189 = vmatprep.subr.mxu1 %v79_v17  ;;  %267 = vmatpush1.msra.mxu0 %v56_v19 }
   0xc   :  { %190 = vmatpush1.msra.mxu1 %v78_v18 }
   0xd   :  { %191 = vmatprep.subr.mxu1 %v71_v20 }
   0xe   :  { %20 = vsyncpa [#allocation4], 0  ;;  %950 = vmatmul.mubr.msk.f32.vlgmr.msra.gmra.mxu0 %vm90_vm0, %v51_v16  ;;  %192 = vmatpush1.msra.mxu1 %v70_v21  ;;  %v55_v24 = vld [vmem:[%s1457_s0 + $0x18] sm:$0xff]  ;;  %v84_v25 = vld [vmem:[%s1459_s2] sm:$0xf]  ;;  %v1079_v28 = vmov 0   ;;  %v415_v13 = vlaneseq }
   0xf   :  { %193 = vmatprep.subr.mxu1 %v63_v22  ;;  %v54_v26 = vld [vmem:[%s1457_s0 + $0x10] sm:$0xff]  ;;  %229 = vmatprep.mubr.f32.mxu1 %v1078_v6  ;;  %v83_v27 = vld [vmem:[%s1457_s0 + $0xf8] sm:$0xff]  ;;  %v477_v40 = vld [vmem:[%s1460_s3 + $0xe8] sm:$0xff]  ;;  %v1080_v11 = vmov 1983009808   ;;  %vm409_vm9 = vcmask 516096  }
  0x10   :  { %194 = vmatpush1.msra.mxu1 %v62_v23  ;;  %1051 = vset.pattern.permute.xlu0 %v1079_v28  ;;  %v82_v29 = vld [vmem:[%s1457_s0 + $0xf0] sm:$0xff]  ;;  %v75_v30 = vld [vmem:[%s1457_s0 + $0xb8] sm:$0xff]  ;;  %v461_v41 = vld [vmem:[%s1460_s3 + $0x68] sm:$0xff]  ;;  %v413_v12 = vunpack.c.l.s4 %v1080_v11  ;;  %vm424_vm10 = vcmask 1040896   ;;  %s1082_s19 = smov 112   ;;  %s1083_s20 = smov 120  }
  0x11   :  { %195 = vmatprep.subr.mxu1 %v55_v24  ;;  %87 = vperm.xlu0 %1051, %v84_v25   ;;  %v74_v31 = vld [vmem:[%s1457_s0 + $0xb0] sm:$0xff]  ;;  %v67_v32 = vld [vmem:[%s1457_s0 + $0x78] sm:$0xff]  ;;  %v476_v42 = vld [vmem:[%s1460_s3 + $0xe0] sm:$0xff]  ;;  %vm1084_vm12 = vmmov 0   ;;  %s1086_s21 = smov 104   ;;  %s1087_s22 = smov 80  }
  0x12   :  { %196 = vmatpush1.msra.mxu1 %v54_v26  ;;  %v66_v33 = vld [vmem:[%s1457_s0 + $0x70] sm:$0xff]  ;;  %v59_v34 = vld [vmem:[%s1457_s0 + $0x38] sm:$0xff]  ;;  %v460_v43 = vld [vmem:[%s1460_s3 + $0x60] sm:$0xff]  ;;  %v414_v25 = vunpack.c.0.s8 %v413_v12  ;;  %v416_v26 = vshrl.u32 %v415_v13, 7  ;;  %s1089_s23 = smov 72   ;;  %vm608_vm13 = vcmask 64512  }
  0x13   :  { %949 = vmatmul.mubr.msk.f32.vlgmr.msra.gmra.mxu1 %vm90_vm0, %v51_v16  ;;  %331 = vmatprep.subr.mxu1 %v83_v27  ;;  %v58_v35 = vld [vmem:[%s1457_s0 + $0x30] sm:$0xff]  ;;  %v479_v36 = vld [vmem:[%s1460_s3 + $0xf8] sm:$0xff]  ;;  %v473_v48 = vld [vmem:[%s1460_s3 + $0xc8] sm:$0xff]  ;;  %s1081_s0 = smov 64   ;;  %vm682_vm14 = vcmask 254976   ;;  %s1090_s27 = smov [#allocation3]  }
  0x14   :  { %332 = vmatpush1.msra.mxu1 %v82_v29  ;;  %371 = vmatprep.mubr.f32.mxu1 %v1078_v6  ;;  %v463_v37 = vld [vmem:[%s1460_s3 + $0x78] sm:$0xff]  ;;  %v478_v38 = vld [vmem:[%s1460_s3 + $0xf0] sm:$0xff]  ;;  %v457_v49 = vld [vmem:[%s1460_s3 + $0x48] sm:$0xff]  ;;  %s940_s2 = sshll.u32 %s1090_s27, 4  ;;  %s941_s2 = int_to_ptr.vmem [resolvable:$true] %s940_s2 }
  0x15   :  { %333 = vmatprep.subr.mxu1 %v75_v30  ;;  %964 = vmatprep.subr.mxu0 %v479_v36  ;;  %v462_v39 = vld [vmem:[%s1460_s3 + $0x70] sm:$0xff]  ;;  %v475_v44 = vld [vmem:[%s1460_s3 + $0xd8] sm:$0xff]  ;;  %v472_v50 = vld [vmem:[%s1460_s3 + $0xc0] sm:$0xff]  ;;  %p1061_p1 = scmp.lt.s32.totalorder %s941_s2, %s941_s2 }
  0x16   :  { %334 = vmatpush1.msra.mxu1 %v74_v31  ;;  %965 = vmatpush3.msra.mxu0 %v463_v37  ;;  %v459_v45 = vld [vmem:[%s1460_s3 + $0x58] sm:$0xff]  ;;  %v474_v46 = vld [vmem:[%s1460_s3 + $0xd0] sm:$0xff]  ;;  %v469_v29 = vld [vmem:[%s1460_s3 + $0xa8] sm:$0xff] }
  0x17   :  { %335 = vmatprep.subr.mxu1 %v67_v32  ;;  %966 = vmatprep.subr.mxu0 %v478_v38  ;;  %v458_v47 = vld [vmem:[%s1460_s3 + $0x50] sm:$0xff]  ;;  %v471_v19 = vld [vmem:[%s1460_s3 + $0xb8] sm:$0xff]  ;;  %v453_v36 = vld [vmem:[%s1460_s3 + $0x28] sm:$0xff] }
  0x18   :  { %336 = vmatpush1.msra.mxu1 %v66_v33  ;;  %967 = vmatpush3.msra.mxu0 %v462_v39  ;;  %v455_v22 = vld [vmem:[%s1460_s3 + $0x38] sm:$0xff]  ;;  %v470_v27 = vld [vmem:[%s1460_s3 + $0xb0] sm:$0xff]  ;;  %v468_v37 = vld [vmem:[%s1460_s3 + $0xa0] sm:$0xff] }
  0x19   :  { %337 = vmatprep.subr.mxu1 %v59_v34  ;;  %968 = vmatprep.subr.mxu0 %v477_v40  ;;  %v454_v28 = vld [vmem:[%s1460_s3 + $0x30] sm:$0xff]  ;;  %v452_v38 = vld [vmem:[%s1460_s3 + $0x20] sm:$0xff]  ;;  %v417_v40 = vsub.s32 %v414_v25, %v416_v26 }
  0x1a   :  { %338 = vmatpush1.msra.mxu1 %v58_v35  ;;  %969 = vmatpush3.msra.mxu0 %v461_v41  ;;  %v467_v41 = vld [vmem:[%s1460_s3 + $0x98] sm:$0xff]  ;;  %v724_v25 = vld [vmem:[%s1466_s9] sm:$0xff] }
  0x1b   :  { %951 = vmatmul.mubr.msk.f32.vlgmr.msra.gmra.mxu1 %vm90_vm0, %v51_v16  ;;  %1011 = vmatprep.subr.mxu1 %v1078_v6  ;;  %v456_v16 = vld [vmem:[%s1460_s3 + $0x40] sm:$0xff] }
  0x1c   :  { %970 = vmatprep.subr.mxu0 %v476_v42  ;;  %1013 = vmatprep.mubr.msk.f32.mxu1 %vm1084_vm12, %v1078_v6  ;;  %v954_v26 = vld [vmem:[%s1463_s6] ss:$0 sm:$0xff] }
  0x1d   :  { %971 = vmatpush3.msra.mxu0 %v460_v43  ;;  %v451_v43 = vld [vmem:[%s1460_s3 + $0x18] sm:$0xff] }
  0x1e   :  { %972 = vmatprep.subr.mxu0 %v475_v44 }
  0x1f   :  { %973 = vmatpush3.msra.mxu0 %v459_v45  ;;  %v466_v45 = vld [vmem:[%s1460_s3 + $0x90] sm:$0xff] }
  0x20   :  { %974 = vmatprep.subr.mxu0 %v474_v46  ;;  %v450_v46 = vld [vmem:[%s1460_s3 + $0x10] sm:$0xff] }
  0x21   :  { %975 = vmatpush3.msra.mxu0 %v458_v47 }
  0x22   :  { %976 = vmatprep.subr.mxu0 %v473_v48  ;;  %v465_v48 = vld [vmem:[%s1460_s3 + $0x88] sm:$0xff] }
  0x23   :  { %977 = vmatpush3.msra.mxu0 %v457_v49  ;;  %v449_v49 = vld [vmem:[%s1460_s3 + $0x8] sm:$0xff] }
  0x24   :  { %978 = vmatprep.subr.mxu0 %v472_v50 }
  0x25   :  { %979 = vmatpush3.msra.mxu0 %v456_v16 }
  0x26   :  { %980 = vmatprep.subr.mxu0 %v471_v19 }
  0x27   :  { %981 = vmatpush3.msra.mxu0 %v455_v22  ;;  %v727_v22 = vld [vmem:[%s1466_s9 + $0x18] sm:$0xff] }
  0x28   :  { %982 = vmatprep.subr.mxu0 %v470_v27 }
  0x29   :  { %983 = vmatpush3.msra.mxu0 %v454_v28 }
  0x2a   :  { %984 = vmatprep.subr.mxu0 %v469_v29 }
  0x2b   :  { %985 = vmatpush3.msra.mxu0 %v453_v36 }
  0x2c   :  { %986 = vmatprep.subr.mxu0 %v468_v37 }
  0x2d   :  { %987 = vmatpush3.msra.mxu0 %v452_v38 }
  0x2e   :  { %988 = vmatprep.subr.mxu0 %v467_v41 }
  0x2f   :  { %989 = vmatpush3.msra.mxu0 %v451_v43 }
  0x30   :  { %990 = vmatprep.subr.mxu0 %v466_v45 }
  0x31   :  { %991 = vmatpush3.msra.mxu0 %v450_v46 }
  0x32   :  { %992 = vmatprep.subr.mxu0 %v465_v48 }
  0x33   :  { %993 = vmatpush3.msra.mxu0 %v449_v49 }
  0x8c   :  { %v88_v51 = vpop.permute.xlu0 %87 }
  0xca   :  { %v160_v52 = vpop.f32.mrf.mxu1 }
  0xcb   :  { %v161_v53 = vadd.f32 %v160_v52, %v88_v51  ;;  %v464_v52 = vld [vmem:[%s1460_s3 + $0x80] sm:$0xff] }
  0xcc   :  { %v162_v54 = vpop.f32.mrf.mxu1  ;;  %994 = vmatprep.subr.mxu0 %v464_v52  ;;  %v957_v52 = vld [vmem:[%s1465_s8] ss:$0 sm:$0xff] }
  0xcd   :  { %v163_v55 = vadd.f32 %v162_v54, %v88_v51  ;;  %v386_v58 = vmul.f32 0.01, %v161_v53  ;;  %vm378_vm2 = vcmp.ge.f32.partialorder %v161_v53, 0.0 }
  0xce   :  { %v302_v56 = vpop.f32.mrf.mxu0 }
  0xcf   :  { %v387_v57 = vmul.f32 0.01, %v163_v55  ;;  %vm379_vm1 = vcmp.ge.f32.partialorder %v163_v55, 0.0  ;;  %v303_v62 = vadd.f32 %v302_v56, %v88_v51  ;;  %v394_v0 = vsel %vm378_vm2, %v161_v53, %v386_v58  ;;  %v448_v53 = vld [vmem:[%s1460_s3] sm:$0xff] }
  0xd0   :  { %v304_v59 = vpop.f32.mrf.mxu0  ;;  %995 = vmatpush3.msra.mxu0 %v448_v53  ;;  %vm932_vm2 = vcmask 58368  }
  0xd1   :  { %v395_v61 = vsel %vm379_vm1, %v163_v55, %v387_v57  ;;  %v305_v2 = vadd.f32 %v304_v59, %v88_v51  ;;  %v390_v7 = vmul.f32 0.01, %v303_v62  ;;  %vm382_vm5 = vcmp.ge.f32.partialorder %v303_v62, 0.0 }
  0xd2   :  { %v402_v5 = vmax.f32 %v394_v0, %v395_v61  ;;  %v952_v0 = vld [vmem:[%s1461_s4] ss:$0 sm:$0xff]  ;;  %s1085_s4 = smov 96  }
  0xd3   :  { %v231_v60 = vpop.f32.mrf.mxu1  ;;  %v391_v14 = vmul.f32 0.01, %v305_v2  ;;  %vm383_vm6 = vcmp.ge.f32.partialorder %v305_v2, 0.0  ;;  %v398_v20 = vsel %vm382_vm5, %v303_v62, %v390_v7 }
  0xd4   :  { %v232_v63 = vadd.f32 %v231_v60, %v88_v51 }
  0xd5   :  { %v233_v1 = vpop.f32.mrf.mxu1  ;;  %v399_v30 = vsel %vm383_vm6, %v305_v2, %v391_v14 }
  0xd6   :  { %vm380_vm3 = vcmp.ge.f32.partialorder %v232_v63, 0.0  ;;  %v388_v3 = vmul.f32 0.01, %v232_v63  ;;  %v234_v4 = vadd.f32 %v233_v1, %v88_v51 }
  0xd8   :  { %v396_v8 = vsel %vm380_vm3, %v232_v63, %v388_v3  ;;  %vm381_vm4 = vcmp.ge.f32.partialorder %v234_v4, 0.0  ;;  %v389_v9 = vmul.f32 0.01, %v234_v4 }
  0xd9   :  { %v403_v10 = vmax.f32 %v402_v5, %v396_v8 }
  0xda   :  { %v397_v15 = vsel %vm381_vm4, %v234_v4, %v389_v9  ;;  %v600_v4 = vld [vmem:[%s1462_s5] sm:$0xff]  ;;  %s1088_s5 = smov 88  }
  0xdb   :  { %v404_v17 = vmax.f32 %v403_v10, %v397_v15  ;;  %v373_v18 = vpop.f32.mrf.mxu1  ;;  %1012 = vmatpush3.msra.mxu1 %v600_v4 }
  0xdc   :  { %v374_v21 = vadd.f32 %v373_v18, %v88_v51  ;;  %1016 = vmatprep.subr.mxu1 %v1078_v6 }
  0xdd   :  { %v405_v23 = vmax.f32 %v404_v17, %v398_v20  ;;  %v375_v24 = vpop.f32.mrf.mxu1 }
  0xde   :  { %vm384_vm7 = vcmp.ge.f32.partialorder %v374_v21, 0.0  ;;  %v392_v31 = vmul.f32 0.01, %v374_v21  ;;  %v376_v32 = vadd.f32 %v375_v24, %v88_v51  ;;  %v725_v24 = vld [vmem:[%s1466_s9 + $0x8] sm:$0xff] }
  0xdf   :  { %v406_v33 = vmax.f32 %v405_v23, %v399_v30  ;;  %v726_v23 = vld [vmem:[%s1466_s9 + $0x10] sm:$0xff] }
  0xe0   :  { %v400_v34 = vsel %vm384_vm7, %v374_v21, %v392_v31  ;;  %vm385_vm8 = vcmp.ge.f32.partialorder %v376_v32, 0.0  ;;  %v393_v35 = vmul.f32 0.01, %v376_v32 }
  0xe1   :  { %v407_v39 = vmax.f32 %v406_v33, %v400_v34 }
  0xe2   :  { %v401_v42 = vsel %vm385_vm8, %v376_v32, %v393_v35 }
  0xe3   :  { %v408_v44 = vmax.f32 %v407_v39, %v401_v42 }
  0xe5   :  { %v418_v47 = vrot.slane %v408_v44, %v417_v40  ;;  %410 = vst.msk [vmem:[#allocation2] sm:$0x1] %vm409_vm9, %v408_v44 }
  0xe7   :  { %435 = vrot.lane.b32.xlu0 %v418_v47, %s1081_s0  ;;  %v426_v50 = vcombine.high %v418_v47, %v418_v47  ;;  %v419_v51 = vrot.slane %v418_v47, 7 }
  0xe9   :  { %441 = vrot.lane.b32.xlu1 %v426_v50, %s1081_s0  ;;  %v429_v54 = vrot.slane %v426_v50, 7  ;;  %428 = vst.msk [vmem:[#allocation2 + $0x2] sm:$0x1] %vm409_vm9, %v426_v50  ;;  %v420_v56 = vrot.slane %v419_v51, 2  ;;  %v956_v50 = vld [vmem:[%s1464_s7] ss:$0 sm:$0xff] }
  0xeb   :  { %v430_v55 = vrot.slane %v429_v54, 2 }
  0xed   :  { %431 = vrot.lane.b32.xlu0 %v430_v55, %s1081_s0  ;;  %421 = vrot.lane.b32.xlu1 %v420_v56, %s1081_s0 }
 0x159   :  { %v436_v57 = vpop.permute.xlu0 %435 }
 0x15a   :  { %438 = vst.msk [vmem:[#allocation2 + $0x1] sm:$0x1] %vm409_vm9, %v436_v57  ;;  %v851_v57 = vld [vmem:[%s1470_s13 + $0x18] sm:$0xff] }
 0x15b   :  { %440 = vst.msk [vmem:[#allocation2 + $0x1] sm:$0x1] %vm424_vm10, %v420_v56  ;;  %v442_v58 = vpop.permute.xlu1 %441 }
 0x15c   :  { %444 = vst.msk [vmem:[#allocation2 + $0x3] sm:$0x1] %vm409_vm9, %v442_v58  ;;  %v850_v58 = vld [vmem:[%s1470_s13 + $0x10] sm:$0xff] }
 0x15d   :  { %446 = vst.msk [vmem:[#allocation2 + $0x3] sm:$0x1] %vm424_vm10, %v430_v55 }
 0x15f   :  { %v432_v59 = vpop.permute.xlu0 %431  ;;  %v422_v60 = vpop.permute.xlu1 %421 }
 0x160   :  { %434 = vst.msk [vmem:[#allocation2 + $0x2] sm:$0x1] %vm424_vm10, %v432_v59  ;;  %425 = vst.msk [vmem:[#allocation2] sm:$0x1] %vm424_vm10, %v422_v60  ;;  %v849_v59 = vld [vmem:[%s1470_s13 + $0x8] sm:$0xff]  ;;  %v848_v60 = vld [vmem:[%s1470_s13] sm:$0xff] }
 0x167   :  { %v953_v61 = vld.sshfl [vmem:[#allocation2] sm:$0x33 pattern:$0x76325410] }
 0x168   :  { %v495_v62 = vcombine.high %v953_v61, %v953_v61 }
 0x16a   :  { %562 = vmatprep.mubr.f32.mxu0 %v495_v62 }
 0x16b   :  { %563 = vmatmul.mubr.f32.vlgmr.msra.gmra.mxu0 %v953_v61  ;;  %v958_v61 = vld [vmem:[%s1467_s10] ss:$0 sm:$0xff] }
 0x22b   :  { %v996_v63 = vpop.f32.mrf.mxu0 }
 0x22d   :  { %v997_v1 = vpop.f32.mrf.mxu0 }
 0x22e   :  { %v998_v2 = vadd.f32 %v997_v1, %v996_v63 }
 0x230   :  { %v565_v3 = vadd.f32 %v998_v2, %v952_v0 }
 0x232   :  { %vm568_vm11 = vcmp.ge.f32.partialorder %v565_v3, 0.0  ;;  %v569_v5 = vmul.f32 0.01, %v565_v3 }
 0x234   :  { %v570_v7 = vsel %vm568_vm11, %v565_v3, %v569_v5 }
 0x235   :  { %576 = vrot.lane.b32.xlu0 %v570_v7, %s1082_s19  ;;  %572 = vrot.lane.b32.xlu1 %v570_v7, %s1083_s20 }
 0x239   :  { %584 = vrot.lane.b32.xlu0 %v570_v7, %s1085_s4  ;;  %580 = vrot.lane.b32.xlu1 %v570_v7, %s1086_s21 }
 0x23d   :  { %592 = vrot.lane.b32.xlu0 %v570_v7, %s1087_s22  ;;  %588 = vrot.lane.b32.xlu1 %v570_v7, %s1088_s5 }
 0x241   :  { %596 = vrot.lane.b32.xlu1 %v570_v7, %s1089_s23 }
 0x2a7   :  { %v577_v8 = vpop.permute.xlu0 %576  ;;  %v573_v9 = vpop.permute.xlu1 %572 }
 0x2a8   :  { %v575_v10 = vmax.f32 %v570_v7, %v573_v9 }
 0x2aa   :  { %v579_v11 = vmax.f32 %v575_v10, %v577_v8 }
 0x2ab   :  { %v585_v12 = vpop.permute.xlu0 %584  ;;  %v581_v13 = vpop.permute.xlu1 %580 }
 0x2ac   :  { %v583_v14 = vmax.f32 %v579_v11, %v581_v13 }
 0x2ae   :  { %v587_v15 = vmax.f32 %v583_v14, %v585_v12 }
 0x2af   :  { %v589_v16 = vpop.permute.xlu1 %588  ;;  %v593_v18 = vpop.permute.xlu0 %592 }
 0x2b0   :  { %v591_v17 = vmax.f32 %v587_v15, %v589_v16 }
 0x2b2   :  { %v595_v19 = vmax.f32 %v591_v17, %v593_v18 }
 0x2b3   :  { %v597_v20 = vpop.permute.xlu1 %596 }
 0x2b4   :  { %v599_v21 = vmax.f32 %v595_v19, %v597_v20 }
 0x2b6   :  { %1014 = vmatmul.mubr.msk.f32.vlgmr.msra.gmra.mxu1 %vm608_vm13, %v599_v21  ;;  %v960_v21 = vld [vmem:[%s1468_s11] ss:$0 sm:$0xff]  ;;  %s1056_s11 = scalar_lea.vmem %s941_s2, 32 }
 0x2b7   :  { %1024 = vmatprep.mubr.msk.f32.mxu1 %vm1084_vm12, %v1078_v6  ;;  %1017 = vmatpush3.msra.mxu1 %v727_v22  ;;  %p1057_p0 = scmp.ne.s32.totalorder %s941_s2, %s1056_s11  ;;  %p1062_p2 = scmp.lt.s32.totalorder %s1056_s11, %s1056_s11 }
 0x2b8   :  { %1018 = vmatprep.subr.mxu1 %v1078_v6 }
 0x2b9   :  { %1019 = vmatpush3.msra.mxu1 %v726_v23  ;;  %v961_v23 = vld [vmem:[%s1469_s12] ss:$0 sm:$0xff]  ;;  %p1063_p3 = por %p1062_p2, %p1061_p1 }
 0x2ba   :  { %1020 = vmatprep.subr.mxu1 %v1078_v6 }
 0x2bb   :  { %1021 = vmatpush3.msra.mxu1 %v725_v24  ;;  %p1064_p4 = pnand %p1063_p3, %p1057_p0 }
 0x2bc   :  { %1022 = vmatprep.subr.mxu1 %v1078_v6 }
 0x2bd   :  { %1023 = vmatpush3.msra.mxu1 %v724_v25 }
 0x2be   :  { %1027 = vmatprep.subr.mxu1 %v1078_v6 }
 0x376   :  { %v678_v27 = vpop.f32.mrf.mxu1 }
 0x377   :  { %v679_v28 = vadd.f32 %v954_v26, %v678_v27 }
 0x378   :  { %v1015_v29 = vpop.f32.mrf.mxu1 }
 0x379   :  { %v683_v30 = vsel %vm682_vm14, %v679_v28, 0.0 }
 0x37a   :  { %v684_v31 = vrot.slane %v683_v30, 4 }
 0x37c   :  { %v685_v32 = vadd.f32 %v684_v31, %v683_v30 }
 0x37e   :  { %v686_v33 = vrot.slane %v685_v32, 2 }
 0x380   :  { %v687_v34 = vadd.f32 %v686_v33, %v685_v32 }
 0x382   :  { %v688_v35 = vrot.slane %v687_v34, 1 }
 0x384   :  { %v689_v36 = vadd.f32 %v688_v35, %v687_v34 }
 0x386   :  { %v691_v37 = vmul.f32 0.5, %v689_v36 }
 0x388   :  { %v692_v38 = vsub.f32 %v679_v28, %v691_v37  ;;  %v962_v28 = vld [vmem:[%s1471_s14] ss:$0 sm:$0xff] }
 0x38a   :  { %v693_v39 = vmul.f32 %v692_v38, %v692_v38 }
 0x38c   :  { %v694_v40 = vsel %vm682_vm14, %v693_v39, 0.0 }
 0x38d   :  { %v695_v41 = vrot.slane %v694_v40, 4 }
 0x38f   :  { %v696_v42 = vadd.f32 %v695_v41, %v694_v40 }
 0x391   :  { %v697_v43 = vrot.slane %v696_v42, 2 }
 0x393   :  { %v698_v44 = vadd.f32 %v697_v43, %v696_v42 }
 0x395   :  { %v699_v45 = vrot.slane %v698_v44, 1 }
 0x397   :  { %v700_v46 = vadd.f32 %v699_v45, %v698_v44 }
 0x399   :  { %v701_v47 = vmul.f32 0.5, %v700_v46 }
 0x39b   :  { %v702_v48 = vadd.f32 1e-05, %v701_v47 }
 0x39d   :  { %1052 = vrsqrt.f32 %v702_v48 }
 0x3aa   :  { %v1053_v49 = vpop.eup %1052 }
 0x3ab   :  { %v704_v51 = vmul.f32 %v1053_v49, %v692_v38 }
 0x3ad   :  { %v712_v53 = vmul.f32 %v956_v50, %v704_v51 }
 0x3af   :  { %v720_v54 = vadd.f32 %v957_v52, %v712_v53 }
 0x3b1   :  { %vm721_vm15 = vcmp.ge.f32.partialorder %v720_v54, 0.0  ;;  %v722_v55 = vmul.f32 0.01, %v720_v54 }
 0x3b3   :  { %v723_v56 = vsel %vm721_vm15, %v720_v54, %v722_v55 }
 0x3b4   :  { %1025 = vmatmul.mubr.msk.f32.vlgmr.msra.gmra.mxu1 %vm90_vm0, %v723_v56 }
 0x3b5   :  { %1035 = vmatprep.mubr.msk.f32.mxu1 %vm1084_vm12, %v1078_v6  ;;  %1028 = vmatpush3.msra.mxu1 %v851_v57 }
 0x3b6   :  { %1029 = vmatprep.subr.mxu1 %v1078_v6 }
 0x3b7   :  { %1030 = vmatpush3.msra.mxu1 %v850_v58 }
 0x3b8   :  { %1031 = vmatprep.subr.mxu1 %v1078_v6 }
 0x3b9   :  { %1032 = vmatpush3.msra.mxu1 %v849_v59 }
 0x3ba   :  { %1033 = vmatprep.subr.mxu1 %v1078_v6 }
 0x3bb   :  { %1034 = vmatpush3.msra.mxu1 %v848_v60 }
 0x474   :  { %v804_v62 = vpop.f32.mrf.mxu1 }
 0x475   :  { %v805_v63 = vadd.f32 %v958_v61, %v804_v62 }
 0x476   :  { %v1026_v0 = vpop.f32.mrf.mxu1 }
 0x477   :  { %v808_v1 = vsel %vm682_vm14, %v805_v63, 0.0 }
 0x478   :  { %v809_v2 = vrot.slane %v808_v1, 4 }
 0x47a   :  { %v810_v3 = vadd.f32 %v809_v2, %v808_v1 }
 0x47c   :  { %v811_v4 = vrot.slane %v810_v3, 2 }
 0x47e   :  { %v812_v5 = vadd.f32 %v811_v4, %v810_v3 }
 0x480   :  { %v813_v7 = vrot.slane %v812_v5, 1 }
 0x482   :  { %v814_v8 = vadd.f32 %v813_v7, %v812_v5 }
 0x484   :  { %v815_v9 = vmul.f32 0.5, %v814_v8 }
 0x486   :  { %v816_v10 = vsub.f32 %v805_v63, %v815_v9 }
 0x488   :  { %v817_v11 = vmul.f32 %v816_v10, %v816_v10 }
 0x48a   :  { %v818_v6 = vsel %vm682_vm14, %v817_v11, 0.0 }
 0x48b   :  { %v819_v12 = vrot.slane %v818_v6, 4 }
 0x48d   :  { %v820_v13 = vadd.f32 %v819_v12, %v818_v6 }
 0x48f   :  { %v821_v14 = vrot.slane %v820_v13, 2 }
 0x491   :  { %v822_v15 = vadd.f32 %v821_v14, %v820_v13 }
 0x493   :  { %v823_v16 = vrot.slane %v822_v15, 1 }
 0x495   :  { %v824_v17 = vadd.f32 %v823_v16, %v822_v15 }
 0x497   :  { %v825_v18 = vmul.f32 0.5, %v824_v17 }
 0x499   :  { %v826_v19 = vadd.f32 1e-05, %v825_v18 }
 0x49b   :  { %1054 = vrsqrt.f32 %v826_v19 }
 0x4a8   :  { %v1055_v20 = vpop.eup %1054 }
 0x4a9   :  { %v828_v22 = vmul.f32 %v1055_v20, %v816_v10 }
 0x4ab   :  { %v836_v24 = vmul.f32 %v960_v21, %v828_v22 }
 0x4ad   :  { %v844_v25 = vadd.f32 %v961_v23, %v836_v24 }
 0x4af   :  { %vm845_vm1 = vcmp.ge.f32.partialorder %v844_v25, 0.0  ;;  %v846_v26 = vmul.f32 0.01, %v844_v25 }
 0x4b1   :  { %v847_v27 = vsel %vm845_vm1, %v844_v25, %v846_v26 }
 0x4b2   :  { %1036 = vmatmul.mubr.msk.f32.vlgmr.msra.gmra.mxu1 %vm90_vm0, %v847_v27 }
 0x572   :  { %v928_v29 = vpop.f32.mrf.mxu1 }
 0x573   :  { %v929_v30 = vadd.f32 %v962_v28, %v928_v29 }
 0x574   :  { %v1037_v31 = vpop.f32.mrf.mxu1 }
 0x575   :  { %933 = vst.msk [vmem:[#allocation3] sm:$0x3] %vm932_vm2, %v929_v30 }
 0x576   :  { %1067 = shalt.err (!%p1064_p4)
}
 0x577   :  { %943 = dma.vmem_to_hbm [thread:$0]  %s941_s2, 32, %s1472_s15, [#allocation4]  }
 0x578   :  { %1076 = dma.done.wait [#allocation4], 32  }
 0x579   :  { %1077 = vsyncadd [#allocation4], 4294967264 }
 0x57a   :  { %947 = vsyncpa [#allocation4], 1 }

</bundles_post_ra>
